<compile_context>
chip_gen: v5e
topology: v5e:2x2
jax: 0.10.0
libtpu: 0.0.40
codegen_flags: <defaults>
</compile_context>

<pallas_src>
import functools

import jax
import jax.numpy as jnp
from jax import lax
from jax.experimental import pallas as pl
from jax.experimental.pallas import tpu as pltpu

_TILE_BYTES = 8 * 1024 * 1024    # target input bytes per pipeline buffer
_CHUNK_BYTES = 1 * 1024 * 1024   # target f32 intermediate bytes per row chunk
_VMEM_LIMIT = 48 * 1024 * 1024   # 2 x 8 MiB input bufs + ~3 MiB temps << limit


def _int_pow(x, n):
    """x ** n for a static Python integer n (VPU multiplies only, no EUP)."""
    if n < 0:
        return 1.0 / _int_pow(x, -n)
    if n == 0:
        return jnp.ones_like(x)
    if n == 1:
        return x
    if n == 2:
        return x * x
    r = _int_pow(x, n // 2)
    r = r * r
    if n % 2:
        r = r * x
    return r


def _gem_kernel(p_ref, x_ref, o_ref, *, eps, hw, rm, n_chunks, int_p):
    # p_ref: (1,1) f32 scalar in SMEM.  x_ref: (tm, hw) tile.  o_ref: (tm, 1).
    if int_p is not None:
        p = None
        inv_p = 1.0 / float(int_p)
    else:
        p = p_ref[0, 0]
        inv_p = 1.0 / p
    inv_hw = 1.0 / float(hw)

    def reduce_rows(x):
        x = x.astype(jnp.float32)
        x = jnp.maximum(x, eps)                              # clamp(min=eps) > 0
        if int_p is not None:
            xp = _int_pow(x, int_p)                          # static-p (VPU only)
        else:
            xp = jnp.exp(p * jnp.log(x))                     # runtime learnable p
        # Lane reduce over the logical hw (Mosaic masks the VMEM lane padding).
        m = jnp.sum(xp, axis=-1, keepdims=True) * inv_hw     # (rm, 1) avg pool
        return jnp.exp(jnp.log(m) * inv_p)                   # m ** (1/p), per row

    if n_chunks == 1:
        o_ref[...] = reduce_rows(x_ref[...]).astype(o_ref.dtype)
    else:
        # Row-chunked accumulation: bounds f32 temporaries to ~rm * hw_lane * 4.
        def body(c, carry):
            start = pl.multiple_of(c * rm, rm)
            y = reduce_rows(x_ref[pl.ds(start, rm), :])
            o_ref[pl.ds(start, rm), :] = y.astype(o_ref.dtype)
            return carry

        lax.fori_loop(0, n_chunks, body, None, unroll=True)


def _choose_tiles(rows, hw, dtype):
    """Returns (tm, rm, num_tiles): row tile, in-kernel row chunk, grid size."""
    itemsize = jnp.dtype(dtype).itemsize
    hw_lane = pl.cdiv(hw, 128) * 128          # lane-padded width as held in VMEM
    pack = max(1, 4 // itemsize)              # 1 f32, 2 bf16, 4 int8/fp8
    sub_min = 8 * pack                        # sublane tiling minimum per dtype

    if rows <= sub_min:
        # Single block, full-dim exception on the row axis.
        return rows, rows, 1

    rows_floor = (rows // sub_min) * sub_min  # largest legal tile <= rows
    chunk_rows = max(sub_min,
                     (_CHUNK_BYTES // (hw_lane * 4)) // sub_min * sub_min)
    half_rows = max(sub_min, (pl.cdiv(rows, 2) // sub_min) * sub_min)
    rm = min(chunk_rows, rows_floor, half_rows)

    n_chunks = max(1, _TILE_BYTES // (rm * hw_lane * itemsize))
    tm = min(rm * n_chunks, rows)             # never exceed the row extent
    tm = max(rm, (tm // rm) * rm)             # whole number of chunks
    num_tiles = pl.cdiv(rows, tm)

    # Megacore: prefer >= 2 grid steps so both v7x TensorCores get work.
    if num_tiles == 1 and rows >= 2 * rm:
        tm = max(rm, ((rows // 2) // rm) * rm)
        num_tiles = pl.cdiv(rows, tm)
    return int(tm), int(rm), int(num_tiles)


def gem_pallas(x, p, eps=1e-6):
    """x: (N, C, H, W).  p: python int/float -> static fast path, jax scalar ->
    runtime (learnable parameter) path.  Returns (N, C, 1, 1)."""
    N, C, H, W = x.shape
    rows, hw = N * C, H * W
    itemsize = jnp.dtype(x.dtype).itemsize

    tm, rm, num_tiles = _choose_tiles(rows, hw, x.dtype)
    n_chunks = tm // rm

    # Static integer-p specialization (removes 2 EUP ops / element).
    int_p = None
    if isinstance(p, (int, float)) and float(p) == int(p) and int(p) != 0:
        int_p = int(p)
    p_arr = jnp.asarray(p, jnp.float32).reshape(1, 1)

    xf = x.reshape(rows, hw)   # layout no-op for row-major (N, C, H, W)

    transc = 0 if int_p is not None else 2
    cost = pl.CostEstimate(
        flops=5 * rows * hw,
        transcendentals=transc * rows * hw + 2 * rows,
        bytes_accessed=rows * hw * itemsize + rows * itemsize,
    )

    out = pl.pallas_call(
        functools.partial(_gem_kernel, eps=float(eps), hw=hw, rm=rm,
                          n_chunks=n_chunks, int_p=int_p),
        out_shape=jax.ShapeDtypeStruct((num_tiles * tm, 1), x.dtype),
        grid=(num_tiles,),
        in_specs=[
            pl.BlockSpec(memory_space=pltpu.MemorySpace.SMEM),   # p (scalar)
            # Full-dim last axis: one contiguous HBM read per row tile, no
            # HBM-side spatial padding; ragged last row tile is masked by Pallas.
            pl.BlockSpec((tm, hw), lambda i: (i, 0)),
        ],
        out_specs=pl.BlockSpec((tm, 1), lambda i: (i, 0)),
        compiler_params=pltpu.CompilerParams(
            dimension_semantics=("parallel",),     # megacore-sharded row tiles
            vmem_limit_bytes=_VMEM_LIMIT),
        cost_estimate=cost,
    )(p_arr, xf)

    return out.reshape(-1)[:rows].reshape(N, C, 1, 1)


def gem_reference(x, p, eps=1e-6):
    xc = jnp.maximum(x, eps)
    m = jnp.mean(xc ** p, axis=(-2, -1), keepdims=True)
    return m ** (1.0 / p)


if __name__ == "__main__":
    key = jax.random.PRNGKey(0)
    eps = 1e-6

    # Main config (matches the module's typical use): N=2, C=4, H=W=16.
    x = jax.random.uniform(key, (2, 4, 16, 16), dtype=jnp.float32)
    p_param = jnp.array(3.0, dtype=jnp.float32)   # nn.Parameter(torch.ones(1)*3)

    y_ref = gem_reference(x, 3.0, eps)

    # Runtime-p path (learnable parameter, exact module semantics).
    y = gem_pallas(x, p_param, eps)
    jax.block_until_ready(y)
    assert y.shape == (2, 4, 1, 1)
    assert jnp.allclose(y, y_ref, atol=1e-4, rtol=1e-4), (
        f"max abs err {jnp.max(jnp.abs(y - y_ref))}")

    # Static integer-p fast path (no per-element transcendentals).
    y_fast = gem_pallas(x, 3, eps)
    jax.block_until_ready(y_fast)
    assert jnp.allclose(y_fast, y_ref, atol=1e-4, rtol=1e-4), (
        f"max abs err {jnp.max(jnp.abs(y_fast - y_ref))}")

    # Ragged case: H*W = 49 (not a multiple of 128), rows = 6 (< sublane min).
    x2 = jax.random.uniform(jax.random.PRNGKey(1), (2, 3, 7, 7),
                            dtype=jnp.float32)
    y2 = gem_pallas(x2, p_param, eps)
    jax.block_until_ready(y2)
    y2_ref = gem_reference(x2, 3.0, eps)
    assert jnp.allclose(y2, y2_ref, atol=1e-4, rtol=1e-4), (
        f"max abs err {jnp.max(jnp.abs(y2 - y2_ref))}")

    # bfloat16 input (dtype-aware sublane tiling; compute still f32 in-kernel).
    xb = x.astype(jnp.bfloat16)
    yb = gem_pallas(xb, 3, eps)
    jax.block_until_ready(yb)
    yb_ref = gem_reference(xb.astype(jnp.float32), 3.0, eps)
    assert jnp.allclose(yb.astype(jnp.float32), yb_ref, atol=2e-2, rtol=2e-2), (
        f"max abs err {jnp.max(jnp.abs(yb.astype(jnp.float32) - yb_ref))}")

    print("KERNEL_OK")
</pallas_src>

<mosaic_0001>
module attributes {stable_mosaic.version = 11 : i64} {
  func.func @_gem_kernel(%arg0: i32, %arg1: memref<1x1xf32, #tpu.memory_space<smem>>, %arg2: memref<8x256xf32, #tpu.memory_space<vmem>>, %arg3: memref<8x1xf32, #tpu.memory_space<vmem>>) attributes {dimension_semantics = [#tpu.dimension_semantics<parallel>], iteration_bounds = array<i64: 1>, scalar_prefetch = 0 : i64, scratch_operands = 0 : i64, tpu.core_type = #tpu.core_type<tc>, window_params = [{transform_indices = @transform_0, window_bounds = array<i64: 1, 1>}, {transform_indices = @transform_1, window_bounds = array<i64: 8, 256>}, {transform_indices = @transform_2, window_bounds = array<i64: 8, 1>}]} {
    %c0 = arith.constant 0 : index
    %c0_0 = arith.constant 0 : index
    %0 = memref.load %arg1[%c0, %c0_0] : memref<1x1xf32, #tpu.memory_space<smem>>
    %cst = arith.constant 1.000000e+00 : f32
    %1 = arith.divf %cst, %0 : f32
    %c0_1 = arith.constant 0 : index
    %c0_2 = arith.constant 0 : index
    %2 = vector.load %arg2[%c0_1, %c0_2] : memref<8x256xf32, #tpu.memory_space<vmem>>, vector<8x256xf32>
    %cst_3 = arith.constant 9.99999997E-7 : f32
    %3 = vector.broadcast %cst_3 : f32 to vector<8x256xf32>
    %4 = arith.maximumf %2, %3 : vector<8x256xf32>
    %5 = math.log %4 : vector<8x256xf32>
    %6 = vector.broadcast %0 : f32 to vector<8x256xf32>
    %7 = arith.mulf %6, %5 : vector<8x256xf32>
    %8 = math.exp %7 : vector<8x256xf32>
    %cst_4 = arith.constant dense<0.000000e+00> : vector<8xf32>
    %9 = vector.multi_reduction <add>, %8, %cst_4 [1] : vector<8x256xf32> to vector<8xf32>
    %10 = vector.shape_cast %9 : vector<8xf32> to vector<8x1xf32>
    %cst_5 = arith.constant 3.906250e-03 : f32
    %11 = vector.broadcast %cst_5 : f32 to vector<8x1xf32>
    %12 = arith.mulf %10, %11 : vector<8x1xf32>
    %13 = math.log %12 : vector<8x1xf32>
    %14 = vector.broadcast %1 : f32 to vector<8x1xf32>
    %15 = arith.mulf %13, %14 : vector<8x1xf32>
    %16 = math.exp %15 : vector<8x1xf32>
    %c0_6 = arith.constant 0 : index
    %c0_7 = arith.constant 0 : index
    %17 = vector.load %arg3[%c0_6, %c0_7] : memref<8x1xf32, #tpu.memory_space<vmem>>, vector<8x1xf32>
    tpu.vector_store %arg3[%c0_6, %c0_7], %16 {strides = array<i32>} : memref<8x1xf32, #tpu.memory_space<vmem>>, vector<8x1xf32>,
    return
  }
  func.func @transform_0(%arg0: i32) -> (i32, i32) {
    %c0_i32 = arith.constant 0 : i32
    %c0_i32_0 = arith.constant 0 : i32
    %c0_i32_1 = arith.constant 0 : i32
    return %c0_i32, %c0_i32_0 : i32, i32
  }
  func.func @transform_1(%arg0: i32) -> (i32, i32) {
    %c0_i32 = arith.constant 0 : i32
    %c0_i32_0 = arith.constant 0 : i32
    return %arg0, %c0_i32 : i32, i32
  }
  func.func @transform_2(%arg0: i32) -> (i32, i32) {
    %c0_i32 = arith.constant 0 : i32
    %c0_i32_0 = arith.constant 0 : i32
    return %arg0, %c0_i32 : i32, i32
  }
}

</mosaic_0001>

<bundles_post_ra>
// kernel: tpu_custom_call.1
= control target key start
LH: loop header
LB: loop body
LE: loop exit
PB: predicated region body
PF: predicated region fallthrough
CT: control target
= control target key end

     0   :  { %8 = vsyncpa [#allocation4], 0  ;;  %s118_s12 = smov [#allocation3]   ;;  %s143_s0 = inlined_call_operand.<no memory space> [shape: f32[1,1], index: 0, kind: input, shape index: {}]   ;;  %s144_s1 = inlined_call_operand.hbm [shape: f32[8,256], index: 1, kind: input, shape index: {}]   ;;  %s145_s2 = inlined_call_operand.vmem [shape: f32[8,1], index: 2, kind: output, shape index: {}]  }
   0x1   :  { %s16_s11 = sshll.u32 %s144_s1, 4  ;;  %s18_s13 = sshll.u32 %s118_s12, 4  ;;  %s17_s11 = int_to_ptr.hbm [resolvable:$true] %s16_s11  ;;  %s19_s13 = int_to_ptr.vmem [resolvable:$true] %s18_s13 }
   0x2   :  { %21 = dma.hbm_to_vmem [thread:$0]  %s17_s11, 256, %s19_s13, [#allocation4]  }
   0x3   :  { %116 = dma.done.wait [#allocation4], 256  }
   0x4   :  { %117 = vsyncadd [#allocation4], 4294967040  ;;  %v27_v0 = vstv %s143_s0  ;;  %v43_v2 = vld [vmem:[#allocation3] sm:$0xff]  ;;  %v44_v3 = vld [vmem:[#allocation3 + $0x8] sm:$0xff]  ;;  %vm68_vm4 = vcmask 7168  }
   0x5   :  { %78 = vrcp.f32 %v27_v0  ;;  %v45_v4 = vmax.f32 %v43_v2, 1e-06  ;;  %v46_v5 = vmax.f32 %v44_v3, 1e-06  ;;  %vm33_vm0 = vweird.f32 %v27_v0 }
   0x6   :  { %v39_v7 = vand.u32 2147483648, %v27_v0  ;;  %v37_v9 = vand.u32 2147483647, %v27_v0 }
   0x7   :  { %80 = vlog2.f32 %v45_v4 }
   0x8   :  { %82 = vlog2.f32 %v46_v5  ;;  %v40_v11 = vor.u32 1.1754944e-38, %v39_v7  ;;  %vm38_vm3 = vcmp.eq.f32.partialorder %v37_v9, 8.507059e+37 }
   0xb   :  { %v79_v1 = vpop.eup %78 }
   0xc   :  { %v29_v6 = vmul.f32 %v79_v1, %v27_v0  ;;  %vm34_vm1 = vweird.f32 %v79_v1 }
   0xd   :  { %vm35_vm2 = vmor %vm33_vm0, %vm34_vm1  ;;  %v81_v13 = vpop.eup %80 }
   0xe   :  { %v30_v8 = vsub.f32 1.0, %v29_v6  ;;  %v83_v15 = vpop.eup %82  ;;  %v48_v16 = vmul.f32 0.6931472, %v81_v13 }
   0xf   :  { %v50_v18 = vmul.f32 0.6931472, %v83_v15 }
  0x10   :  { %v31_v10 = vmul.f32 %v79_v1, %v30_v8  ;;  %v52_v19 = vmul.f32 %v48_v16, %v27_v0 }
  0x11   :  { %v53_v20 = vmul.f32 %v50_v18, %v27_v0 }
  0x12   :  { %v32_v12 = vadd.f32 %v79_v1, %v31_v10  ;;  %v54_v21 = vmul.f32 1.442695, %v52_v19 }
  0x13   :  { %v56_v22 = vmul.f32 1.442695, %v53_v20 }
  0x14   :  { %v36_v14 = vsel %vm35_vm2, %v79_v1, %v32_v12  ;;  %84 = vpow2.f32 %v54_v21 }
  0x15   :  { %v41_v17 = vsel %vm38_vm3, %v40_v11, %v36_v14  ;;  %86 = vpow2.f32 %v56_v22 }
  0x16   :  { %75 = vpush %v41_v17 }
  0x1a   :  { %v85_v23 = vpop.eup %84 }
  0x1b   :  { %v87_v24 = vpop.eup %86 }
  0x1c   :  { %v58_v25 = vadd.f32 %v87_v24, %v85_v23 }
  0x1e   :  { %59 = vadd.xlane.f32.xlu0 %v58_v25 }
  0x47   :  { %s76_s0 = spop %75 }
  0x48   :  { %v64_v29 = vstv %s76_s0 }
  0x91   :  { %v60_v26 = vpop.xlane.xlu0 %59 }
  0x92   :  { %v61_v27 = vmul.f32 0.00390625, %v60_v26 }
  0x94   :  { %88 = vlog2.f32 %v61_v27 }
  0x9a   :  { %v89_v28 = vpop.eup %88 }
  0x9b   :  { %v63_v30 = vmul.f32 0.6931472, %v89_v28 }
  0x9d   :  { %v65_v31 = vmul.f32 %v64_v29, %v63_v30 }
  0x9f   :  { %v66_v32 = vmul.f32 1.442695, %v65_v31 }
  0xa1   :  { %90 = vpow2.f32 %v66_v32 }
  0xa7   :  { %v91_v33 = vpop.eup %90 }
  0xa8   :  { %69 = vst.msk [vmem:[%s145_s2] sm:$0xff] %vm68_vm4, %v91_v33 }
  0xa9   :  { %74 = vsyncpa [#allocation4], 1 }

</bundles_post_ra>
